<compile_context>
chip_gen: v7x
topology: tpu7x:2x2x1
jax: 0.10.0
libtpu: 0.0.40
codegen_flags: <defaults>
</compile_context>

<pallas_src>
import math

import jax
import jax.numpy as jnp
from jax.experimental import pallas as pl
from jax.experimental.pallas import tpu as pltpu

_INV_SQRT2 = 0.7071067811865476
_MIB = 1024 * 1024


def _gelu_exact(x):
    # PyTorch nn.GELU() default = exact (erf-based) GELU.  Constant multiply
    # instead of a divide keeps extra work off the single EUP slot erf uses.
    return 0.5 * x * (1.0 + jax.lax.erf(x * jnp.asarray(_INV_SQRT2, x.dtype)))


def _round_up(x, m):
    return ((x + m - 1) // m) * m


def _sublane_multiple(dtype):
    # Rows per vreg sublane group: f32 -> 8, bf16 -> 16, int8/fp8 -> 32.
    itemsize = jnp.dtype(dtype).itemsize
    return max(8, 8 * (4 // max(1, itemsize)))


def _tensorcores_per_chip():
    try:
        kind = jax.devices()[0].device_kind.lower()
        if "v7" in kind or "7x" in kind:
            return 2
    except Exception:
        pass
    return 1


def _vmem_capacity_bytes():
    try:
        cap = int(pltpu.get_tpu_info().vmem_capacity_bytes)
        if cap > 0:
            return cap
    except Exception:
        pass
    try:
        kind = jax.devices()[0].device_kind.lower()
        if "v5" in kind or "v6" in kind:
            return 128 * _MIB
    except Exception:
        pass
    return 64 * _MIB  # conservative default (v7x per-TC VMEM)


def _vmem_estimate(tm, km, e_pad, cbytes, obytes, x_bufs):
    return (x_bufs * tm * e_pad * cbytes      # x tile
            + 2 * e_pad * km * cbytes         # w1 chunk (double-buffered)
            + 2 * km * e_pad * cbytes         # w2 chunk (double-buffered)
            + 2 * km * 4 + e_pad * 4          # biases
            + 2 * tm * e_pad * obytes         # output tile (double-buffered)
            + tm * e_pad * 4                  # f32 accumulator scratch
            + tm * km * 4                     # f32 GELU intermediate
            + tm * e_pad * 4)                 # f32 lin1/epilogue temporaries


# ---------------------------------------------------------------------------
# Kernels
# ---------------------------------------------------------------------------
def _mlp_kernel_fused(x_ref, w1_ref, b1_ref, w2_ref, b2_ref, o_ref):
    # Single mlp_dim chunk: no accumulator scratch / read-modify-write.
    h = jnp.dot(x_ref[...], w1_ref[...], preferred_element_type=jnp.float32)
    h = _gelu_exact(h + b1_ref[...])
    y = jnp.dot(h.astype(w2_ref.dtype), w2_ref[...],
                preferred_element_type=jnp.float32)
    o_ref[...] = (y + b2_ref[...]).astype(o_ref.dtype)


def _mlp_kernel_chunked(x_ref, w1_ref, b1_ref, w2_ref, b2_ref, o_ref, acc_ref):
    # Grid: (row tiles [parallel], mlp_dim chunks [arbitrary / reduction]).
    j = pl.program_id(1)

    # lin1 chunk: (tm, E) @ (E, km) -> f32, bias + GELU in f32.
    h = jnp.dot(x_ref[...], w1_ref[...], preferred_element_type=jnp.float32)
    h = _gelu_exact(h + b1_ref[...])

    # lin2 partial: (tm, km) @ (km, E), accumulated in f32.
    partial = jnp.dot(h.astype(w2_ref.dtype), w2_ref[...],
                      preferred_element_type=jnp.float32)

    @pl.when(j == 0)
    def _():
        acc_ref[...] = partial          # first chunk writes directly

    @pl.when(j > 0)
    def _():
        acc_ref[...] += partial

    @pl.when(j == pl.num_programs(1) - 1)
    def _():
        o_ref[...] = (acc_ref[...] + b2_ref[...]).astype(o_ref.dtype)


# ---------------------------------------------------------------------------
# Wrapper
# ---------------------------------------------------------------------------
def prepare_mlp_params(w1, b1, w2, b2, *, km=512, compute_dtype=jnp.bfloat16):
    """Pre-pad / pre-cast weights once so mlp_block's pad/cast are no-ops.

    Call mlp_block with the same km / compute_dtype to get the zero-copy path.
    """
    E, M = w1.shape
    e_pad = _round_up(E, 128)
    km_eff = min(_round_up(km, 128), _round_up(M, 128))
    m_pad = _round_up(M, km_eff)
    w1p = jnp.pad(w1, ((0, e_pad - E), (0, m_pad - M))).astype(compute_dtype)
    w2p = jnp.pad(w2, ((0, m_pad - M), (0, e_pad - E))).astype(compute_dtype)
    b1p = jnp.pad(b1, (0, m_pad - M)).astype(jnp.float32)
    b2p = jnp.pad(b2, (0, e_pad - E)).astype(jnp.float32)
    return w1p, b1p, w2p, b2p


def mlp_block(x, w1, b1, w2, b2, *, tm=512, km=512,
              compute_dtype=jnp.bfloat16):
    """lin2(GELU(lin1(x))).

    x: (..., E).  w1: (E, M), b1: (M,), w2: (M, E), b2: (E,)
    (weights pre-transposed: (in_features, out_features); optionally already
    padded/cast via prepare_mlp_params).
    """
    orig_shape = x.shape
    out_dtype = x.dtype
    E = orig_shape[-1]
    M = w1.shape[1]

    x2d = x.reshape(-1, E)
    N = x2d.shape[0]

    cbytes = jnp.dtype(compute_dtype).itemsize
    obytes = jnp.dtype(out_dtype).itemsize
    sub = max(_sublane_multiple(compute_dtype), _sublane_multiple(out_dtype))

    # ---- tile sizing ------------------------------------------------------
    E_pad = _round_up(E, 128)
    km_eff = min(_round_up(km, 128), _round_up(M, 128))
    tm_eff = min(_round_up(tm, sub), _round_up(N, sub))

    capacity = _vmem_capacity_bytes()
    # Generation-aware scoped-VMEM budget: ~48 MiB on v7x (64 MiB/TC),
    # up to ~100 MiB on v5e/v6e (128 MiB physical).
    budget = max(32 * _MIB, min(capacity - 16 * _MIB, 100 * _MIB))

    # Shrink tiles (rows first, then reduction chunk) until they fit.
    while (tm_eff > sub and
           _vmem_estimate(tm_eff, km_eff, E_pad, cbytes, obytes, 2) > budget):
        tm_eff = max(sub, _round_up(tm_eff // 2, sub))
    while (km_eff > 128 and
           _vmem_estimate(tm_eff, km_eff, E_pad, cbytes, obytes, 2) > budget):
        km_eff = max(128, _round_up(km_eff // 2, 128))

    # On 2-TC chips make sure the "parallel" row axis has >= 2 tiles.
    if (_tensorcores_per_chip() >= 2 and _round_up(N, sub) >= 2 * sub
            and _round_up(N, tm_eff) // tm_eff < 2):
        tm_eff = _round_up(-(-N // 2), sub)

    M_pad = _round_up(M, km_eff)
    N_pad = _round_up(N, tm_eff)
    grid_m = N_pad // tm_eff
    grid_k = M_pad // km_eff
    multi_chunk = grid_k > 1

    # Single-buffer x only where VMEM is tight (v7x) AND x is constant across
    # the inner reduction axis (so its DMA is exposed once per row tile only).
    x_bufs = 1 if (capacity <= 64 * _MIB and multi_chunk) else 2

    # ---- pad / cast (elided when already satisfied) -------------------------
    # Zero padding is exact: padded h columns are GELU(0 + 0) == 0 and padded
    # w2 rows / output columns are 0, so the valid region is untouched.
    def _cast(a, dt):
        return a if a.dtype == dt else a.astype(dt)

    def _pad2(a, r, c):
        if a.shape == (r, c):
            return a
        return jnp.pad(a, ((0, r - a.shape[0]), (0, c - a.shape[1])))

    def _pad1(a, n):
        return a if a.shape == (n,) else jnp.pad(a, (0, n - a.shape[0]))

    xp = _cast(_pad2(x2d, N_pad, E_pad), compute_dtype)
    w1p = _cast(_pad2(w1, E_pad, M_pad), compute_dtype)
    w2p = _cast(_pad2(w2, M_pad, E_pad), compute_dtype)
    b1p = _cast(_pad1(b1, M_pad), jnp.float32).reshape(1, M_pad)
    b2p = _cast(_pad1(b2, E_pad), jnp.float32).reshape(1, E_pad)

    vmem_limit = int(max(
        32 * _MIB,
        min(budget, 2 * _vmem_estimate(tm_eff, km_eff, E_pad,
                                       cbytes, obytes, x_bufs))))

    # w1/w2 (+ biases) are re-streamed once per row tile -> multiply by grid_m.
    cost = pl.CostEstimate(
        flops=2 * 2 * N_pad * E_pad * M_pad,
        transcendentals=N_pad * M_pad,
        bytes_accessed=(N_pad * E_pad * cbytes
                        + grid_m * (2 * E_pad * M_pad * cbytes
                                    + (M_pad + E_pad) * 4)
                        + N_pad * E_pad * obytes),
    )

    def _build_and_call(use_buffered):
        def spec(shape, index_map, bufs=None):
            if not use_buffered or bufs is None:
                return pl.BlockSpec(shape, index_map)
            try:
                return pl.BlockSpec(shape, index_map,
                                    pipeline_mode=pl.Buffered(bufs))
            except TypeError:  # jax without pipeline_mode kwarg
                return pl.BlockSpec(shape, index_map)

        if not multi_chunk:
            # Weights are grid-constant: single-buffer everything but x / out.
            grid_spec = pltpu.PrefetchScalarGridSpec(
                num_scalar_prefetch=0,
                grid=(grid_m,),
                in_specs=[
                    spec((tm_eff, E_pad), lambda i: (i, 0)),
                    spec((E_pad, km_eff), lambda i: (0, 0), bufs=1),
                    spec((1, km_eff), lambda i: (0, 0), bufs=1),
                    spec((km_eff, E_pad), lambda i: (0, 0), bufs=1),
                    spec((1, E_pad), lambda i: (0, 0), bufs=1),
                ],
                out_specs=pl.BlockSpec((tm_eff, E_pad), lambda i: (i, 0)),
            )
            kernel = _mlp_kernel_fused
            dims = ("parallel",)
        else:
            grid_spec = pltpu.PrefetchScalarGridSpec(
                num_scalar_prefetch=0,
                grid=(grid_m, grid_k),
                in_specs=[
                    spec((tm_eff, E_pad), lambda i, j: (i, 0),
                         bufs=(1 if x_bufs == 1 else None)),
                    spec((E_pad, km_eff), lambda i, j: (0, j)),   # w1 chunk
                    spec((1, km_eff), lambda i, j: (0, j)),       # b1 chunk
                    spec((km_eff, E_pad), lambda i, j: (j, 0)),   # w2 chunk
                    spec((1, E_pad), lambda i, j: (0, 0), bufs=1),  # b2
                ],
                out_specs=pl.BlockSpec((tm_eff, E_pad), lambda i, j: (i, 0)),
                scratch_shapes=[pltpu.VMEM((tm_eff, E_pad), jnp.float32)],
            )
            kernel = _mlp_kernel_chunked
            dims = ("parallel", "arbitrary")

        return pl.pallas_call(
            kernel,
            out_shape=jax.ShapeDtypeStruct((N_pad, E_pad), out_dtype),
            grid_spec=grid_spec,
            compiler_params=pltpu.CompilerParams(
                dimension_semantics=dims,
                vmem_limit_bytes=vmem_limit,
            ),
            cost_estimate=cost,
        )(xp, w1p, b1p, w2p, b2p)

    try:
        out = _build_and_call(True)
    except Exception:
        # Fallback: some jax versions reject Buffered(1) block specs; use
        # plain double-buffering everywhere instead.
        out = _build_and_call(False)

    if N_pad != N or E_pad != E:
        out = out[:N, :E]
    return out.reshape(orig_shape)


# ---------------------------------------------------------------------------
# Init + reference + demo
# ---------------------------------------------------------------------------
def init_mlp_params(key, embedding_dim, mlp_dim, dtype=jnp.float32):
    """Deterministic init mirroring nn.Linear's default (+/- 1/sqrt(fan_in))."""
    k1, k2, k3, k4 = jax.random.split(key, 4)
    bound1 = 1.0 / math.sqrt(embedding_dim)
    bound2 = 1.0 / math.sqrt(mlp_dim)
    w1 = jax.random.uniform(k1, (embedding_dim, mlp_dim), dtype, -bound1, bound1)
    b1 = jax.random.uniform(k2, (mlp_dim,), dtype, -bound1, bound1)
    w2 = jax.random.uniform(k3, (mlp_dim, embedding_dim), dtype, -bound2, bound2)
    b2 = jax.random.uniform(k4, (embedding_dim,), dtype, -bound2, bound2)
    return w1, b1, w2, b2


def _reference(x, w1, b1, w2, b2, compute_dtype):
    # Pure-JAX reference mirroring the kernel's mixed-precision recipe.
    xc = x.astype(compute_dtype)
    h = jnp.dot(xc, w1.astype(compute_dtype), preferred_element_type=jnp.float32)
    h = _gelu_exact(h + b1.astype(jnp.float32))
    y = jnp.dot(h.astype(compute_dtype), w2.astype(compute_dtype),
                preferred_element_type=jnp.float32)
    return (y + b2.astype(jnp.float32)).astype(x.dtype)


if __name__ == "__main__":
    key = jax.random.PRNGKey(0)
    kx, kp, kq = jax.random.split(key, 3)

    batch, seq, embedding_dim, mlp_dim = 2, 8, 32, 64
    x = jax.random.normal(kx, (batch, seq, embedding_dim), jnp.float32)
    w1, b1, w2, b2 = init_mlp_params(kp, embedding_dim, mlp_dim)

    # 1) f32 compute path: exact semantics of the PyTorch module.
    out_f32 = jax.block_until_ready(
        mlp_block(x, w1, b1, w2, b2, compute_dtype=jnp.float32))
    ref_f32 = _reference(x, w1, b1, w2, b2, jnp.float32)
    assert out_f32.shape == x.shape
    assert jnp.allclose(out_f32, ref_f32, atol=1e-5, rtol=1e-5)

    # 2) Default bf16-MXU path: bf16 operands, f32 accumulation / bias / GELU.
    out_bf16 = jax.block_until_ready(mlp_block(x, w1, b1, w2, b2))
    ref_bf16 = _reference(x, w1, b1, w2, b2, jnp.bfloat16)
    assert out_bf16.shape == x.shape
    assert jnp.allclose(out_bf16, ref_bf16, atol=2e-3, rtol=2e-3)
    assert jnp.allclose(out_bf16, ref_f32, atol=5e-2, rtol=5e-2)

    # 3) Chunked-reduction path (mlp_dim split across the inner grid axis)
    #    with pre-prepared (padded + cast) weights.
    mlp_dim2 = 256
    w1b, b1b, w2b, b2b = init_mlp_params(kq, embedding_dim, mlp_dim2)
    prep = prepare_mlp_params(w1b, b1b, w2b, b2b, km=128,
                              compute_dtype=jnp.bfloat16)
    out_ck = jax.block_until_ready(mlp_block(x, *prep, km=128))
    ref_ck = _reference(x, w1b, b1b, w2b, b2b, jnp.bfloat16)
    assert out_ck.shape == x.shape
    assert jnp.allclose(out_ck, ref_ck, atol=2e-3, rtol=2e-3)

    print("KERNEL_OK")
</pallas_src>

<mosaic_0001>
module attributes {stable_mosaic.version = 11 : i64} {
  func.func @_mlp_kernel_fused(%arg0: i32, %arg1: memref<16x128xf32, #tpu.memory_space<vmem>>, %arg2: memref<128x128xf32, #tpu.memory_space<vmem>>, %arg3: memref<1x128xf32, #tpu.memory_space<vmem>>, %arg4: memref<128x128xf32, #tpu.memory_space<vmem>>, %arg5: memref<1x128xf32, #tpu.memory_space<vmem>>, %arg6: memref<16x128xf32, #tpu.memory_space<vmem>>) attributes {dimension_semantics = [#tpu.dimension_semantics<parallel>], iteration_bounds = array<i64: 1>, scalar_prefetch = 0 : i64, scratch_operands = 0 : i64, tpu.core_type = #tpu.core_type<tc>, window_params = [{transform_indices = @transform_0, window_bounds = array<i64: 16, 128>}, {pipeline_mode = #tpu.pipeline_mode<synchronous>, transform_indices = @transform_1, window_bounds = array<i64: 128, 128>}, {pipeline_mode = #tpu.pipeline_mode<synchronous>, transform_indices = @transform_2, window_bounds = array<i64: 1, 128>}, {pipeline_mode = #tpu.pipeline_mode<synchronous>, transform_indices = @transform_3, window_bounds = array<i64: 128, 128>}, {pipeline_mode = #tpu.pipeline_mode<synchronous>, transform_indices = @transform_4, window_bounds = array<i64: 1, 128>}, {transform_indices = @transform_5, window_bounds = array<i64: 16, 128>}]} {
    %c0 = arith.constant 0 : index
    %c0_0 = arith.constant 0 : index
    %0 = vector.load %arg1[%c0, %c0_0] : memref<16x128xf32, #tpu.memory_space<vmem>>, vector<16x128xf32>
    %c0_1 = arith.constant 0 : index
    %c0_2 = arith.constant 0 : index
    %1 = vector.load %arg2[%c0_1, %c0_2] : memref<128x128xf32, #tpu.memory_space<vmem>>, vector<128x128xf32>
    %cst = arith.constant dense<0.000000e+00> : vector<16x128xf32>
    %2 = tpu.matmul %0, %1, %cst {dimension_numbers = #tpu.dot_dimension_numbers<[1], [0], [0], [1], [0, 0, 1, 1], [], []>} : vector<16x128xf32>, vector<128x128xf32>, vector<16x128xf32> -> vector<16x128xf32>
    %c0_3 = arith.constant 0 : index
    %c0_4 = arith.constant 0 : index
    %3 = vector.load %arg3[%c0_3, %c0_4] : memref<1x128xf32, #tpu.memory_space<vmem>>, vector<1x128xf32>
    %4 = vector.broadcast %3 : vector<1x128xf32> to vector<16x128xf32>
    %5 = arith.addf %2, %4 : vector<16x128xf32>
    %cst_5 = arith.constant 5.000000e-01 : f32
    %6 = vector.broadcast %cst_5 : f32 to vector<16x128xf32>
    %7 = arith.mulf %6, %5 : vector<16x128xf32>
    %cst_6 = arith.constant 0.707106769 : f32
    %8 = vector.broadcast %cst_6 : f32 to vector<16x128xf32>
    %9 = arith.mulf %5, %8 : vector<16x128xf32>
    %10 = math.erf %9 : vector<16x128xf32>
    %cst_7 = arith.constant 1.000000e+00 : f32
    %11 = vector.broadcast %cst_7 : f32 to vector<16x128xf32>
    %12 = arith.addf %11, %10 : vector<16x128xf32>
    %13 = arith.mulf %7, %12 : vector<16x128xf32>
    %c0_8 = arith.constant 0 : index
    %c0_9 = arith.constant 0 : index
    %14 = vector.load %arg4[%c0_8, %c0_9] : memref<128x128xf32, #tpu.memory_space<vmem>>, vector<128x128xf32>
    %cst_10 = arith.constant dense<0.000000e+00> : vector<16x128xf32>
    %15 = tpu.matmul %13, %14, %cst_10 {dimension_numbers = #tpu.dot_dimension_numbers<[1], [0], [0], [1], [0, 0, 1, 1], [], []>} : vector<16x128xf32>, vector<128x128xf32>, vector<16x128xf32> -> vector<16x128xf32>
    %c0_11 = arith.constant 0 : index
    %c0_12 = arith.constant 0 : index
    %16 = vector.load %arg5[%c0_11, %c0_12] : memref<1x128xf32, #tpu.memory_space<vmem>>, vector<1x128xf32>
    %17 = vector.broadcast %16 : vector<1x128xf32> to vector<16x128xf32>
    %18 = arith.addf %15, %17 : vector<16x128xf32>
    %c0_13 = arith.constant 0 : index
    %c0_14 = arith.constant 0 : index
    %19 = vector.load %arg6[%c0_13, %c0_14] : memref<16x128xf32, #tpu.memory_space<vmem>>, vector<16x128xf32>
    tpu.vector_store %arg6[%c0_13, %c0_14], %18 {strides = array<i32>} : memref<16x128xf32, #tpu.memory_space<vmem>>, vector<16x128xf32>,
    return
  }
  func.func @transform_0(%arg0: i32) -> (i32, i32) {
    %c0_i32 = arith.constant 0 : i32
    %c0_i32_0 = arith.constant 0 : i32
    return %arg0, %c0_i32 : i32, i32
  }
  func.func @transform_1(%arg0: i32) -> (i32, i32) {
    %c0_i32 = arith.constant 0 : i32
    %c0_i32_0 = arith.constant 0 : i32
    %c0_i32_1 = arith.constant 0 : i32
    return %c0_i32, %c0_i32_0 : i32, i32
  }
  func.func @transform_2(%arg0: i32) -> (i32, i32) {
    %c0_i32 = arith.constant 0 : i32
    %c0_i32_0 = arith.constant 0 : i32
    %c0_i32_1 = arith.constant 0 : i32
    return %c0_i32, %c0_i32_0 : i32, i32
  }
  func.func @transform_3(%arg0: i32) -> (i32, i32) {
    %c0_i32 = arith.constant 0 : i32
    %c0_i32_0 = arith.constant 0 : i32
    %c0_i32_1 = arith.constant 0 : i32
    return %c0_i32, %c0_i32_0 : i32, i32
  }
  func.func @transform_4(%arg0: i32) -> (i32, i32) {
    %c0_i32 = arith.constant 0 : i32
    %c0_i32_0 = arith.constant 0 : i32
    %c0_i32_1 = arith.constant 0 : i32
    return %c0_i32, %c0_i32_0 : i32, i32
  }
  func.func @transform_5(%arg0: i32) -> (i32, i32) {
    %c0_i32 = arith.constant 0 : i32
    %c0_i32_0 = arith.constant 0 : i32
    return %arg0, %c0_i32 : i32, i32
  }
}

module attributes {stable_mosaic.version = 11 : i64} {
  func.func @_mlp_kernel_fused(%arg0: i32, %arg1: memref<16x128xf32, #tpu.memory_space<vmem>>, %arg2: memref<128x128xf32, #tpu.memory_space<vmem>>, %arg3: memref<1x128xf32, #tpu.memory_space<vmem>>, %arg4: memref<128x128xf32, #tpu.memory_space<vmem>>, %arg5: memref<1x128xf32, #tpu.memory_space<vmem>>, %arg6: memref<16x128xf32, #tpu.memory_space<vmem>>) attributes {dimension_semantics = [#tpu.dimension_semantics<parallel>], iteration_bounds = array<i64: 1>, scalar_prefetch = 0 : i64, scratch_operands = 0 : i64, tpu.core_type = #tpu.core_type<tc>, window_params = [{transform_indices = @transform_0, window_bounds = array<i64: 16, 128>}, {pipeline_mode = #tpu.pipeline_mode<synchronous>, transform_indices = @transform_1, window_bounds = array<i64: 128, 128>}, {pipeline_mode = #tpu.pipeline_mode<synchronous>, transform_indices = @transform_2, window_bounds = array<i64: 1, 128>}, {pipeline_mode = #tpu.pipeline_mode<synchronous>, transform_indices = @transform_3, window_bounds = array<i64: 128, 128>}, {pipeline_mode = #tpu.pipeline_mode<synchronous>, transform_indices = @transform_4, window_bounds = array<i64: 1, 128>}, {transform_indices = @transform_5, window_bounds = array<i64: 16, 128>}]} {
    %c0 = arith.constant 0 : index
    %c0_0 = arith.constant 0 : index
    %0 = vector.load %arg1[%c0, %c0_0] : memref<16x128xf32, #tpu.memory_space<vmem>>, vector<16x128xf32>
    %c0_1 = arith.constant 0 : index
    %c0_2 = arith.constant 0 : index
    %1 = vector.load %arg2[%c0_1, %c0_2] : memref<128x128xf32, #tpu.memory_space<vmem>>, vector<128x128xf32>
    %cst = arith.constant dense<0.000000e+00> : vector<16x128xf32>
    %2 = tpu.matmul %0, %1, %cst {dimension_numbers = #tpu.dot_dimension_numbers<[1], [0], [0], [1], [0, 0, 1, 1], [], []>} : vector<16x128xf32>, vector<128x128xf32>, vector<16x128xf32> -> vector<16x128xf32>
    %c0_3 = arith.constant 0 : index
    %c0_4 = arith.constant 0 : index
    %3 = vector.load %arg3[%c0_3, %c0_4] : memref<1x128xf32, #tpu.memory_space<vmem>>, vector<1x128xf32>
    %4 = vector.broadcast %3 : vector<1x128xf32> to vector<16x128xf32>
    %5 = arith.addf %2, %4 : vector<16x128xf32>
    %cst_5 = arith.constant 5.000000e-01 : f32
    %6 = vector.broadcast %cst_5 : f32 to vector<16x128xf32>
    %7 = arith.mulf %6, %5 : vector<16x128xf32>
    %cst_6 = arith.constant 0.707106769 : f32
    %8 = vector.broadcast %cst_6 : f32 to vector<16x128xf32>
    %9 = arith.mulf %5, %8 : vector<16x128xf32>
    %10 = math.erf %9 : vector<16x128xf32>
    %cst_7 = arith.constant 1.000000e+00 : f32
    %11 = vector.broadcast %cst_7 : f32 to vector<16x128xf32>
    %12 = arith.addf %11, %10 : vector<16x128xf32>
    %13 = arith.mulf %7, %12 : vector<16x128xf32>
    %c0_8 = arith.constant 0 : index
    %c0_9 = arith.constant 0 : index
    %14 = vector.load %arg4[%c0_8, %c0_9] : memref<128x128xf32, #tpu.memory_space<vmem>>, vector<128x128xf32>
    %cst_10 = arith.constant dense<0.000000e+00> : vector<16x128xf32>
    %15 = tpu.matmul %13, %14, %cst_10 {dimension_numbers = #tpu.dot_dimension_numbers<[1], [0], [0], [1], [0, 0, 1, 1], [], []>} : vector<16x128xf32>, vector<128x128xf32>, vector<16x128xf32> -> vector<16x128xf32>
    %c0_11 = arith.constant 0 : index
    %c0_12 = arith.constant 0 : index
    %16 = vector.load %arg5[%c0_11, %c0_12] : memref<1x128xf32, #tpu.memory_space<vmem>>, vector<1x128xf32>
    %17 = vector.broadcast %16 : vector<1x128xf32> to vector<16x128xf32>
    %18 = arith.addf %15, %17 : vector<16x128xf32>
    %c0_13 = arith.constant 0 : index
    %c0_14 = arith.constant 0 : index
    %19 = vector.load %arg6[%c0_13, %c0_14] : memref<16x128xf32, #tpu.memory_space<vmem>>, vector<16x128xf32>
    tpu.vector_store %arg6[%c0_13, %c0_14], %18 {strides = array<i32>} : memref<16x128xf32, #tpu.memory_space<vmem>>, vector<16x128xf32>,
    return
  }
  func.func @transform_0(%arg0: i32) -> (i32, i32) {
    %c0_i32 = arith.constant 0 : i32
    %c0_i32_0 = arith.constant 0 : i32
    return %arg0, %c0_i32 : i32, i32
  }
  func.func @transform_1(%arg0: i32) -> (i32, i32) {
    %c0_i32 = arith.constant 0 : i32
    %c0_i32_0 = arith.constant 0 : i32
    %c0_i32_1 = arith.constant 0 : i32
    return %c0_i32, %c0_i32_0 : i32, i32
  }
  func.func @transform_2(%arg0: i32) -> (i32, i32) {
    %c0_i32 = arith.constant 0 : i32
    %c0_i32_0 = arith.constant 0 : i32
    %c0_i32_1 = arith.constant 0 : i32
    return %c0_i32, %c0_i32_0 : i32, i32
  }
  func.func @transform_3(%arg0: i32) -> (i32, i32) {
    %c0_i32 = arith.constant 0 : i32
    %c0_i32_0 = arith.constant 0 : i32
    %c0_i32_1 = arith.constant 0 : i32
    return %c0_i32, %c0_i32_0 : i32, i32
  }
  func.func @transform_4(%arg0: i32) -> (i32, i32) {
    %c0_i32 = arith.constant 0 : i32
    %c0_i32_0 = arith.constant 0 : i32
    %c0_i32_1 = arith.constant 0 : i32
    return %c0_i32, %c0_i32_0 : i32, i32
  }
  func.func @transform_5(%arg0: i32) -> (i32, i32) {
    %c0_i32 = arith.constant 0 : i32
    %c0_i32_0 = arith.constant 0 : i32
    return %arg0, %c0_i32 : i32, i32
  }
}

</mosaic_0001>

<bundles_post_ra>
// kernel: tpu_custom_call.1
= control target key start
LH: loop header
LB: loop body
LE: loop exit
PB: predicated region body
PF: predicated region fallthrough
CT: control target
= control target key end

     0   :  { %10 = vsyncpa [#allocation3], 0  ;;  %s675_s0 = inlined_call_operand.hbm [shape: f32[16,128], index: 0, kind: input, shape index: {}]   ;;  %s676_s1 = inlined_call_operand.hbm [shape: f32[128,128], index: 1, kind: input, shape index: {}]   ;;  %s677_s2 = inlined_call_operand.vmem [shape: f32[1,128], index: 2, kind: input, shape index: {}]   ;;  %s678_s3 = inlined_call_operand.hbm [shape: f32[128,128], index: 3, kind: input, shape index: {}]   ;;  %s679_s4 = inlined_call_operand.vmem [shape: f32[1,128], index: 4, kind: input, shape index: {}]   ;;  %s680_s5 = inlined_call_operand.hbm [shape: f32[16,128], index: 5, kind: output, shape index: {}]  }
   0x1   :  { %11 = vsyncpa [#allocation6], 0 }
   0x2   :  { %12 = vsyncpa [#allocation4], 0  ;;  %s566_s18 = smov [#allocation5]   ;;  %s567_s20 = smov [#allocation2]  }
   0x3   :  { %s30_s19 = sshll.u32 %s566_s18, 4  ;;  %s18_s21 = sshll.u32 %s567_s20, 4  ;;  %s31_s19 = int_to_ptr.vmem [resolvable:$true] %s30_s19  ;;  %s602_s21 = int_to_ptr.vmem [resolvable:$true] %s18_s21 }
   0x4   :  { %s472_s24 = scalar_lea.hbm %s676_s1, 2048 }
   0x5   :  { %p473_p0 = scmp.ne.s32.totalorder %s676_s1, %s472_s24  ;;  %p476_p1 = scmp.lt.u32.totalorder %s472_s24, %s676_s1 }
   0x7   :  { %p478_p2 = pnand %p476_p1, %p473_p0 }
   0x9   :  { %481 = shalt.err (!%p478_p2)
}
   0xa   :  { %s482_s29 = scalar_lea.vmem %s31_s19, 2048  ;;  %p487_p4 = scmp.lt.s32.totalorder %s31_s19, %s31_s19 }
   0xb   :  { %p483_p3 = scmp.ne.s32.totalorder %s31_s19, %s482_s29  ;;  %p488_p5 = scmp.lt.s32.totalorder %s482_s29, %s482_s29 }
   0xd   :  { %p489_p6 = por %p488_p5, %p487_p4 }
   0xf   :  { %p490_p7 = pnand %p489_p6, %p483_p3 }
  0x11   :  { %493 = shalt.err (!%p490_p7)
}
  0x12   :  { %s568_s30 = smov 128   ;;  %s569_s6 = smov 8  }
  0x13   :  { %36 = dma.hbm_to_vmem [thread:$0]  %s676_s1, 2048, %s31_s19, [#allocation6], %s568_s30, %s568_s30, %s569_s6  }
  0x14   :  { %s494_s11 = scalar_lea.hbm %s675_s0, 256 }
  0x15   :  { %p495_p8 = scmp.ne.s32.totalorder %s675_s0, %s494_s11  ;;  %p498_p9 = scmp.lt.u32.totalorder %s494_s11, %s675_s0 }
  0x17   :  { %p500_p10 = pnand %p498_p9, %p495_p8 }
  0x19   :  { %503 = shalt.err (!%p500_p10)
}
  0x1a   :  { %s504_s16 = scalar_lea.vmem %s602_s21, 256  ;;  %p509_p12 = scmp.lt.s32.totalorder %s602_s21, %s602_s21 }
  0x1b   :  { %p505_p11 = scmp.ne.s32.totalorder %s602_s21, %s504_s16  ;;  %p510_p13 = scmp.lt.s32.totalorder %s504_s16, %s504_s16 }
  0x1d   :  { %p511_p0 = por %p510_p13, %p509_p12 }
  0x1f   :  { %p512_p1 = pnand %p511_p0, %p505_p11 }
  0x21   :  { %515 = shalt.err (!%p512_p1)
}
  0x22   :  { %24 = dma.hbm_to_vmem [thread:$0]  %s675_s0, 256, %s602_s21, [#allocation3], %s568_s30, %s568_s30, %s569_s6  }
  0x23   :  { %s570_s18 = smov [#allocation7]   ;;  %s516_s23 = scalar_lea.hbm %s678_s3, 2048 }
  0x24   :  { %s44_s19 = sshll.u32 %s570_s18, 4  ;;  %p517_p2 = scmp.ne.s32.totalorder %s678_s3, %s516_s23  ;;  %s45_s19 = int_to_ptr.vmem [resolvable:$true] %s44_s19 }
  0x25   :  { %p520_p3 = scmp.lt.u32.totalorder %s516_s23, %s678_s3 }
  0x27   :  { %p522_p4 = pnand %p520_p3, %p517_p2 }
  0x29   :  { %525 = shalt.err (!%p522_p4)
}
  0x2a   :  { %s526_s28 = scalar_lea.vmem %s45_s19, 2048  ;;  %p531_p6 = scmp.lt.s32.totalorder %s45_s19, %s45_s19 }
  0x2b   :  { %p527_p5 = scmp.ne.s32.totalorder %s45_s19, %s526_s28  ;;  %p532_p7 = scmp.lt.s32.totalorder %s526_s28, %s526_s28 }
  0x2d   :  { %p533_p8 = por %p532_p7, %p531_p6 }
  0x2f   :  { %p534_p9 = pnand %p533_p8, %p527_p5 }
  0x31   :  { %537 = shalt.err (!%p534_p9)
}
  0x32   :  { %50 = dma.hbm_to_vmem [thread:$0]  %s678_s3, 2048, %s45_s19, [#allocation6], %s568_s30, %s568_s30, %s569_s6  }
  0x33   :  { %560 = dma.done.wait [#allocation3], 256  }
  0x34   :  { %561 = vsyncadd [#allocation3], 4294967040 }
  0x35   :  { %562 = dma.done.wait [#allocation6], 4096  }
  0x36   :  { %563 = vsyncadd [#allocation6], 4294963200  ;;  %v64_v0 = vld [vmem:[#allocation5] sm:$0xff]  ;;  %v65_v1 = vld [vmem:[#allocation5 + $0x8] sm:$0xff]  ;;  %s571_s8 = smov [#allocation8]  }
  0x37   :  { %v66_v2 = vld [vmem:[#allocation5 + $0x10] sm:$0xff]  ;;  %v398_v3 = vpack.c.bf16 %v65_v1, %v64_v0  ;;  %v67_v4 = vld [vmem:[#allocation5 + $0x18] sm:$0xff]  ;;  %v68_v6 = vld [vmem:[#allocation5 + $0x20] sm:$0xff]  ;;  %s277_s9 = sshll.u32 %s571_s8, 4  ;;  %s278_s9 = int_to_ptr.vmem [resolvable:$true] %s277_s9 }
  0x38   :  { %v402_v5 = vpack.c.bf16 %v67_v4, %v66_v2  ;;  %v69_v7 = vld [vmem:[#allocation5 + $0x28] sm:$0xff]  ;;  %v70_v9 = vld [vmem:[#allocation5 + $0x30] sm:$0xff]  ;;  %v71_v10 = vld [vmem:[#allocation5 + $0x38] sm:$0xff]  ;;  %s538_s10 = scalar_lea.vmem %s278_s9, 256  ;;  %p543_p11 = scmp.lt.s32.totalorder %s278_s9, %s278_s9 }
  0x39   :  { %399 = vmatprep.subr.bf16.mxu0 %v398_v3  ;;  %v406_v8 = vpack.c.bf16 %v69_v7, %v68_v6  ;;  %v62_v11 = vld [vmem:[#allocation2] sm:$0xff]  ;;  %v172_v12 = vld [vmem:[#allocation7] sm:$0xff]  ;;  %v173_v13 = vld [vmem:[#allocation7 + $0x8] sm:$0xff]  ;;  %v410_v20 = vpack.c.bf16 %v71_v10, %v70_v9  ;;  %p539_p10 = scmp.ne.s32.totalorder %s278_s9, %s538_s10  ;;  %p544_p12 = scmp.lt.s32.totalorder %s538_s10, %s538_s10 }
  0x3a   :  { %401 = vmatpush3.bf16.msra.mxu0 %v398_v3  ;;  %360 = vmatprep.mubr.f32.mxu0 %v62_v11  ;;  %v174_v14 = vld [vmem:[#allocation7 + $0x10] sm:$0xff]  ;;  %v430_v15 = vpack.c.bf16 %v173_v13, %v172_v12  ;;  %v175_v16 = vld [vmem:[#allocation7 + $0x18] sm:$0xff]  ;;  %v176_v18 = vld [vmem:[#allocation7 + $0x20] sm:$0xff] }
  0x3b   :  { %403 = vmatprep.subr.bf16.mxu0 %v402_v5  ;;  %v434_v17 = vpack.c.bf16 %v175_v16, %v174_v14  ;;  %v177_v19 = vld [vmem:[#allocation7 + $0x28] sm:$0xff]  ;;  %v72_v21 = vld [vmem:[#allocation5 + $0x40] sm:$0xff]  ;;  %v74_v25 = vld [vmem:[#allocation5 + $0x50] sm:$0xff]  ;;  %p545_p13 = por %p544_p12, %p543_p11 }
  0x3c   :  { %431 = vmatprep.subr.bf16.mxu1 %v430_v15  ;;  %v73_v22 = vld [vmem:[#allocation5 + $0x48] sm:$0xff]  ;;  %v438_v23 = vpack.c.bf16 %v177_v19, %v176_v18  ;;  %v75_v26 = vld [vmem:[#allocation5 + $0x58] sm:$0xff]  ;;  %v76_v28 = vld [vmem:[#allocation5 + $0x60] sm:$0xff] }
  0x3d   :  { %433 = vmatpush3.bf16.msra.mxu1 %v430_v15  ;;  %v414_v24 = vpack.c.bf16 %v73_v22, %v72_v21  ;;  %v418_v27 = vpack.c.bf16 %v75_v26, %v74_v25  ;;  %v77_v29 = vld [vmem:[#allocation5 + $0x68] sm:$0xff]  ;;  %v78_v31 = vld [vmem:[#allocation5 + $0x70] sm:$0xff]  ;;  %v79_v32 = vld [vmem:[#allocation5 + $0x78] sm:$0xff]  ;;  %p546_p0 = pnand %p545_p13, %p539_p10 }
  0x3e   :  { %405 = vmatpush3.bf16.msra.mxu0 %v402_v5  ;;  %435 = vmatprep.subr.bf16.mxu1 %v434_v17  ;;  %v422_v30 = vpack.c.bf16 %v77_v29, %v76_v28  ;;  %v426_v33 = vpack.c.bf16 %v79_v32, %v78_v31  ;;  %v63_v34 = vld [vmem:[#allocation2 + $0x8] sm:$0xff]  ;;  %v178_v35 = vld [vmem:[#allocation7 + $0x30] sm:$0xff]  ;;  %v180_v38 = vld [vmem:[#allocation7 + $0x40] sm:$0xff] }
  0x3f   :  { %407 = vmatprep.subr.bf16.mxu0 %v406_v8  ;;  %v179_v36 = vld [vmem:[#allocation7 + $0x38] sm:$0xff]  ;;  %v181_v39 = vld [vmem:[#allocation7 + $0x48] sm:$0xff]  ;;  %v182_v41 = vld [vmem:[#allocation7 + $0x50] sm:$0xff] }
  0x40   :  { %v442_v37 = vpack.c.bf16 %v179_v36, %v178_v35  ;;  %v446_v40 = vpack.c.bf16 %v181_v39, %v180_v38  ;;  %v183_v42 = vld [vmem:[#allocation7 + $0x58] sm:$0xff]  ;;  %v184_v44 = vld [vmem:[#allocation7 + $0x60] sm:$0xff]  ;;  %v185_v45 = vld [vmem:[#allocation7 + $0x68] sm:$0xff] }
  0x41   :  { %437 = vmatpush3.bf16.msra.mxu1 %v434_v17  ;;  %v450_v43 = vpack.c.bf16 %v183_v42, %v182_v41  ;;  %v454_v46 = vpack.c.bf16 %v185_v45, %v184_v44  ;;  %v186_v47 = vld [vmem:[#allocation7 + $0x70] sm:$0xff]  ;;  %v187_v48 = vld [vmem:[#allocation7 + $0x78] sm:$0xff] }
  0x42   :  { %409 = vmatpush3.bf16.msra.mxu0 %v406_v8  ;;  %439 = vmatprep.subr.bf16.mxu1 %v438_v23  ;;  %v458_v49 = vpack.c.bf16 %v187_v48, %v186_v47  ;;  %v290_v50 = vld [vmem:[%s677_s2] ss:$0 sm:$0xff] }
  0x43   :  { %411 = vmatprep.subr.bf16.mxu0 %v410_v20  ;;  %v291_v1 = vld [vmem:[%s679_s4] ss:$0 sm:$0xff] }
  0x45   :  { %441 = vmatpush3.bf16.msra.mxu1 %v438_v23 }
  0x46   :  { %413 = vmatpush3.bf16.msra.mxu0 %v410_v20  ;;  %443 = vmatprep.subr.bf16.mxu1 %v442_v37 }
  0x47   :  { %415 = vmatprep.subr.bf16.mxu0 %v414_v24 }
  0x49   :  { %445 = vmatpush3.bf16.msra.mxu1 %v442_v37 }
  0x4a   :  { %417 = vmatpush3.bf16.msra.mxu0 %v414_v24  ;;  %447 = vmatprep.subr.bf16.mxu1 %v446_v40 }
  0x4b   :  { %419 = vmatprep.subr.bf16.mxu0 %v418_v27 }
  0x4d   :  { %449 = vmatpush3.bf16.msra.mxu1 %v446_v40 }
  0x4e   :  { %421 = vmatpush3.bf16.msra.mxu0 %v418_v27  ;;  %451 = vmatprep.subr.bf16.mxu1 %v450_v43 }
  0x4f   :  { %423 = vmatprep.subr.bf16.mxu0 %v422_v30 }
  0x51   :  { %453 = vmatpush3.bf16.msra.mxu1 %v450_v43 }
  0x52   :  { %425 = vmatpush3.bf16.msra.mxu0 %v422_v30  ;;  %455 = vmatprep.subr.bf16.mxu1 %v454_v46 }
  0x53   :  { %427 = vmatprep.subr.bf16.mxu0 %v426_v33 }
  0x55   :  { %457 = vmatpush3.bf16.msra.mxu1 %v454_v46 }
  0x56   :  { %429 = vmatpush3.bf16.msra.mxu0 %v426_v33  ;;  %459 = vmatprep.subr.bf16.mxu1 %v458_v49 }
  0x59   :  { %361 = vmatmul.mubr.f32.vlgmr.msra.gmra.mrb[0].mxu0 %v63_v34  ;;  %461 = vmatpush3.bf16.msra.mxu1 %v458_v49 }
 0x12c   :  { %v362_v51 = vpop.f32.mrb[0].mxu0 }
 0x12d   :  { %v159_v52 = vadd.f32 %v362_v51, %v290_v50  ;;  %v153_v53 = vpop.f32.mrb[1].mxu0 }
 0x12e   :  { %v154_v54 = vadd.f32 %v290_v50, %v153_v53 }
 0x12f   :  { %v165_v55 = vmul.f32 0.70710677, %v159_v52  ;;  %v163_v62 = vmul.f32 0.5, %v159_v52 }
 0x130   :  { %v164_v56 = vmul.f32 0.70710677, %v154_v54  ;;  %v162_v60 = vmul.f32 0.5, %v154_v54 }
 0x131   :  { %468 = verf.f32 %v165_v55 }
 0x132   :  { %470 = verf.f32 %v164_v56 }
 0x13b   :  { %v469_v57 = vpop.eup %468 }
 0x13c   :  { %v471_v58 = vpop.eup %470  ;;  %v169_v59 = vadd.f32 1.0, %v469_v57 }
 0x13d   :  { %v168_v61 = vadd.f32 1.0, %v471_v58 }
 0x13e   :  { %v171_v0 = vmul.f32 %v169_v59, %v163_v62 }
 0x13f   :  { %v170_v63 = vmul.f32 %v168_v61, %v162_v60 }
 0x141   :  { %395 = vmatprep.mubr.f32.mxu1 %v170_v63 }
 0x142   :  { %396 = vmatmul.mubr.f32.vlgmr.msra.gmra.mrb[0].mxu1 %v171_v0 }
 0x215   :  { %v397_v2 = vpop.f32.mrb[0].mxu1 }
 0x216   :  { %v267_v3 = vadd.f32 %v397_v2, %v291_v1  ;;  %v261_v4 = vpop.f32.mrb[1].mxu1 }
 0x217   :  { %v262_v5 = vadd.f32 %v291_v1, %v261_v4 }
 0x218   :  { %271 = vst [vmem:[#allocation8 + $0x8] sm:$0xff] %v267_v3 }
 0x219   :  { %270 = vst [vmem:[#allocation8] sm:$0xff] %v262_v5 }
 0x21a   :  { %549 = shalt.err (!%p546_p0)
}
 0x21b   :  { %s550_s4 = scalar_lea.hbm %s680_s5, 256 }
 0x21c   :  { %p551_p1 = scmp.ne.s32.totalorder %s680_s5, %s550_s4  ;;  %p554_p2 = scmp.lt.u32.totalorder %s550_s4, %s680_s5 }
 0x21e   :  { %p556_p3 = pnand %p554_p2, %p551_p1 }
 0x220   :  { %559 = shalt.err (!%p556_p3)
}
 0x221   :  { %283 = dma.vmem_to_hbm [thread:$0]  %s278_s9, 256, %s680_s5, [#allocation4], %s568_s30, %s568_s30, %s569_s6  }
 0x222   :  { %564 = dma.done.wait [#allocation4], 256  }
 0x223   :  { %565 = vsyncadd [#allocation4], 4294967040 }
 0x224   :  { %287 = vsyncpa [#allocation3], 1 }
 0x225   :  { %288 = vsyncpa [#allocation6], 1 }
 0x226   :  { %289 = vsyncpa [#allocation4], 1 }

// kernel: tpu_custom_call.1
= control target key start
LH: loop header
LB: loop body
LE: loop exit
PB: predicated region body
PF: predicated region fallthrough
CT: control target
= control target key end

     0   :  { %10 = vsyncpa [#allocation3], 0  ;;  %s675_s0 = inlined_call_operand.hbm [shape: f32[16,128], index: 0, kind: input, shape index: {}]   ;;  %s676_s1 = inlined_call_operand.hbm [shape: f32[128,128], index: 1, kind: input, shape index: {}]   ;;  %s677_s2 = inlined_call_operand.vmem [shape: f32[1,128], index: 2, kind: input, shape index: {}]   ;;  %s678_s3 = inlined_call_operand.hbm [shape: f32[128,128], index: 3, kind: input, shape index: {}]   ;;  %s679_s4 = inlined_call_operand.vmem [shape: f32[1,128], index: 4, kind: input, shape index: {}]   ;;  %s680_s5 = inlined_call_operand.hbm [shape: f32[16,128], index: 5, kind: output, shape index: {}]  }
   0x1   :  { %11 = vsyncpa [#allocation6], 0 }
   0x2   :  { %12 = vsyncpa [#allocation4], 0  ;;  %s566_s18 = smov [#allocation5]   ;;  %s567_s20 = smov [#allocation2]  }
   0x3   :  { %s30_s19 = sshll.u32 %s566_s18, 4  ;;  %s18_s21 = sshll.u32 %s567_s20, 4  ;;  %s31_s19 = int_to_ptr.vmem [resolvable:$true] %s30_s19  ;;  %s602_s21 = int_to_ptr.vmem [resolvable:$true] %s18_s21 }
   0x4   :  { %s472_s24 = scalar_lea.hbm %s676_s1, 2048 }
   0x5   :  { %p473_p0 = scmp.ne.s32.totalorder %s676_s1, %s472_s24  ;;  %p476_p1 = scmp.lt.u32.totalorder %s472_s24, %s676_s1 }
   0x7   :  { %p478_p2 = pnand %p476_p1, %p473_p0 }
   0x9   :  { %481 = shalt.err (!%p478_p2)
}
   0xa   :  { %s482_s29 = scalar_lea.vmem %s31_s19, 2048  ;;  %p487_p4 = scmp.lt.s32.totalorder %s31_s19, %s31_s19 }
   0xb   :  { %p483_p3 = scmp.ne.s32.totalorder %s31_s19, %s482_s29  ;;  %p488_p5 = scmp.lt.s32.totalorder %s482_s29, %s482_s29 }
   0xd   :  { %p489_p6 = por %p488_p5, %p487_p4 }
   0xf   :  { %p490_p7 = pnand %p489_p6, %p483_p3 }
  0x11   :  { %493 = shalt.err (!%p490_p7)
}
  0x12   :  { %s568_s30 = smov 128   ;;  %s569_s6 = smov 8  }
  0x13   :  { %36 = dma.hbm_to_vmem [thread:$0]  %s676_s1, 2048, %s31_s19, [#allocation6], %s568_s30, %s568_s30, %s569_s6  }
  0x14   :  { %s494_s11 = scalar_lea.hbm %s675_s0, 256 }
  0x15   :  { %p495_p8 = scmp.ne.s32.totalorder %s675_s0, %s494_s11  ;;  %p498_p9 = scmp.lt.u32.totalorder %s494_s11, %s675_s0 }
  0x17   :  { %p500_p10 = pnand %p498_p9, %p495_p8 }
  0x19   :  { %503 = shalt.err (!%p500_p10)
}
  0x1a   :  { %s504_s16 = scalar_lea.vmem %s602_s21, 256  ;;  %p509_p12 = scmp.lt.s32.totalorder %s602_s21, %s602_s21 }
  0x1b   :  { %p505_p11 = scmp.ne.s32.totalorder %s602_s21, %s504_s16  ;;  %p510_p13 = scmp.lt.s32.totalorder %s504_s16, %s504_s16 }
  0x1d   :  { %p511_p0 = por %p510_p13, %p509_p12 }
  0x1f   :  { %p512_p1 = pnand %p511_p0, %p505_p11 }
  0x21   :  { %515 = shalt.err (!%p512_p1)
}
  0x22   :  { %24 = dma.hbm_to_vmem [thread:$0]  %s675_s0, 256, %s602_s21, [#allocation3], %s568_s30, %s568_s30, %s569_s6  }
  0x23   :  { %s570_s18 = smov [#allocation7]   ;;  %s516_s23 = scalar_lea.hbm %s678_s3, 2048 }
  0x24   :  { %s44_s19 = sshll.u32 %s570_s18, 4  ;;  %p517_p2 = scmp.ne.s32.totalorder %s678_s3, %s516_s23  ;;  %s45_s19 = int_to_ptr.vmem [resolvable:$true] %s44_s19 }
  0x25   :  { %p520_p3 = scmp.lt.u32.totalorder %s516_s23, %s678_s3 }
  0x27   :  { %p522_p4 = pnand %p520_p3, %p517_p2 }
  0x29   :  { %525 = shalt.err (!%p522_p4)
}
  0x2a   :  { %s526_s28 = scalar_lea.vmem %s45_s19, 2048  ;;  %p531_p6 = scmp.lt.s32.totalorder %s45_s19, %s45_s19 }
  0x2b   :  { %p527_p5 = scmp.ne.s32.totalorder %s45_s19, %s526_s28  ;;  %p532_p7 = scmp.lt.s32.totalorder %s526_s28, %s526_s28 }
  0x2d   :  { %p533_p8 = por %p532_p7, %p531_p6 }
  0x2f   :  { %p534_p9 = pnand %p533_p8, %p527_p5 }
  0x31   :  { %537 = shalt.err (!%p534_p9)
}
  0x32   :  { %50 = dma.hbm_to_vmem [thread:$0]  %s678_s3, 2048, %s45_s19, [#allocation6], %s568_s30, %s568_s30, %s569_s6  }
  0x33   :  { %560 = dma.done.wait [#allocation3], 256  }
  0x34   :  { %561 = vsyncadd [#allocation3], 4294967040 }
  0x35   :  { %562 = dma.done.wait [#allocation6], 4096  }
  0x36   :  { %563 = vsyncadd [#allocation6], 4294963200  ;;  %v64_v0 = vld [vmem:[#allocation5] sm:$0xff]  ;;  %v65_v1 = vld [vmem:[#allocation5 + $0x8] sm:$0xff]  ;;  %s571_s8 = smov [#allocation8]  }
  0x37   :  { %v66_v2 = vld [vmem:[#allocation5 + $0x10] sm:$0xff]  ;;  %v398_v3 = vpack.c.bf16 %v65_v1, %v64_v0  ;;  %v67_v4 = vld [vmem:[#allocation5 + $0x18] sm:$0xff]  ;;  %v68_v6 = vld [vmem:[#allocation5 + $0x20] sm:$0xff]  ;;  %s277_s9 = sshll.u32 %s571_s8, 4  ;;  %s278_s9 = int_to_ptr.vmem [resolvable:$true] %s277_s9 }
  0x38   :  { %v402_v5 = vpack.c.bf16 %v67_v4, %v66_v2  ;;  %v69_v7 = vld [vmem:[#allocation5 + $0x28] sm:$0xff]  ;;  %v70_v9 = vld [vmem:[#allocation5 + $0x30] sm:$0xff]  ;;  %v71_v10 = vld [vmem:[#allocation5 + $0x38] sm:$0xff]  ;;  %s538_s10 = scalar_lea.vmem %s278_s9, 256  ;;  %p543_p11 = scmp.lt.s32.totalorder %s278_s9, %s278_s9 }
  0x39   :  { %399 = vmatprep.subr.bf16.mxu0 %v398_v3  ;;  %v406_v8 = vpack.c.bf16 %v69_v7, %v68_v6  ;;  %v62_v11 = vld [vmem:[#allocation2] sm:$0xff]  ;;  %v172_v12 = vld [vmem:[#allocation7] sm:$0xff]  ;;  %v173_v13 = vld [vmem:[#allocation7 + $0x8] sm:$0xff]  ;;  %v410_v20 = vpack.c.bf16 %v71_v10, %v70_v9  ;;  %p539_p10 = scmp.ne.s32.totalorder %s278_s9, %s538_s10  ;;  %p544_p12 = scmp.lt.s32.totalorder %s538_s10, %s538_s10 }
  0x3a   :  { %401 = vmatpush3.bf16.msra.mxu0 %v398_v3  ;;  %360 = vmatprep.mubr.f32.mxu0 %v62_v11  ;;  %v174_v14 = vld [vmem:[#allocation7 + $0x10] sm:$0xff]  ;;  %v430_v15 = vpack.c.bf16 %v173_v13, %v172_v12  ;;  %v175_v16 = vld [vmem:[#allocation7 + $0x18] sm:$0xff]  ;;  %v176_v18 = vld [vmem:[#allocation7 + $0x20] sm:$0xff] }
  0x3b   :  { %403 = vmatprep.subr.bf16.mxu0 %v402_v5  ;;  %v434_v17 = vpack.c.bf16 %v175_v16, %v174_v14  ;;  %v177_v19 = vld [vmem:[#allocation7 + $0x28] sm:$0xff]  ;;  %v72_v21 = vld [vmem:[#allocation5 + $0x40] sm:$0xff]  ;;  %v74_v25 = vld [vmem:[#allocation5 + $0x50] sm:$0xff]  ;;  %p545_p13 = por %p544_p12, %p543_p11 }
  0x3c   :  { %431 = vmatprep.subr.bf16.mxu1 %v430_v15  ;;  %v73_v22 = vld [vmem:[#allocation5 + $0x48] sm:$0xff]  ;;  %v438_v23 = vpack.c.bf16 %v177_v19, %v176_v18  ;;  %v75_v26 = vld [vmem:[#allocation5 + $0x58] sm:$0xff]  ;;  %v76_v28 = vld [vmem:[#allocation5 + $0x60] sm:$0xff] }
  0x3d   :  { %433 = vmatpush3.bf16.msra.mxu1 %v430_v15  ;;  %v414_v24 = vpack.c.bf16 %v73_v22, %v72_v21  ;;  %v418_v27 = vpack.c.bf16 %v75_v26, %v74_v25  ;;  %v77_v29 = vld [vmem:[#allocation5 + $0x68] sm:$0xff]  ;;  %v78_v31 = vld [vmem:[#allocation5 + $0x70] sm:$0xff]  ;;  %v79_v32 = vld [vmem:[#allocation5 + $0x78] sm:$0xff]  ;;  %p546_p0 = pnand %p545_p13, %p539_p10 }
  0x3e   :  { %405 = vmatpush3.bf16.msra.mxu0 %v402_v5  ;;  %435 = vmatprep.subr.bf16.mxu1 %v434_v17  ;;  %v422_v30 = vpack.c.bf16 %v77_v29, %v76_v28  ;;  %v426_v33 = vpack.c.bf16 %v79_v32, %v78_v31  ;;  %v63_v34 = vld [vmem:[#allocation2 + $0x8] sm:$0xff]  ;;  %v178_v35 = vld [vmem:[#allocation7 + $0x30] sm:$0xff]  ;;  %v180_v38 = vld [vmem:[#allocation7 + $0x40] sm:$0xff] }
  0x3f   :  { %407 = vmatprep.subr.bf16.mxu0 %v406_v8  ;;  %v179_v36 = vld [vmem:[#allocation7 + $0x38] sm:$0xff]  ;;  %v181_v39 = vld [vmem:[#allocation7 + $0x48] sm:$0xff]  ;;  %v182_v41 = vld [vmem:[#allocation7 + $0x50] sm:$0xff] }
  0x40   :  { %v442_v37 = vpack.c.bf16 %v179_v36, %v178_v35  ;;  %v446_v40 = vpack.c.bf16 %v181_v39, %v180_v38  ;;  %v183_v42 = vld [vmem:[#allocation7 + $0x58] sm:$0xff]  ;;  %v184_v44 = vld [vmem:[#allocation7 + $0x60] sm:$0xff]  ;;  %v185_v45 = vld [vmem:[#allocation7 + $0x68] sm:$0xff] }
  0x41   :  { %437 = vmatpush3.bf16.msra.mxu1 %v434_v17  ;;  %v450_v43 = vpack.c.bf16 %v183_v42, %v182_v41  ;;  %v454_v46 = vpack.c.bf16 %v185_v45, %v184_v44  ;;  %v186_v47 = vld [vmem:[#allocation7 + $0x70] sm:$0xff]  ;;  %v187_v48 = vld [vmem:[#allocation7 + $0x78] sm:$0xff] }
  0x42   :  { %409 = vmatpush3.bf16.msra.mxu0 %v406_v8  ;;  %439 = vmatprep.subr.bf16.mxu1 %v438_v23  ;;  %v458_v49 = vpack.c.bf16 %v187_v48, %v186_v47  ;;  %v290_v50 = vld [vmem:[%s677_s2] ss:$0 sm:$0xff] }
  0x43   :  { %411 = vmatprep.subr.bf16.mxu0 %v410_v20  ;;  %v291_v1 = vld [vmem:[%s679_s4] ss:$0 sm:$0xff] }
  0x45   :  { %441 = vmatpush3.bf16.msra.mxu1 %v438_v23 }
  0x46   :  { %413 = vmatpush3.bf16.msra.mxu0 %v410_v20  ;;  %443 = vmatprep.subr.bf16.mxu1 %v442_v37 }
  0x47   :  { %415 = vmatprep.subr.bf16.mxu0 %v414_v24 }
  0x49   :  { %445 = vmatpush3.bf16.msra.mxu1 %v442_v37 }
  0x4a   :  { %417 = vmatpush3.bf16.msra.mxu0 %v414_v24  ;;  %447 = vmatprep.subr.bf16.mxu1 %v446_v40 }
  0x4b   :  { %419 = vmatprep.subr.bf16.mxu0 %v418_v27 }
  0x4d   :  { %449 = vmatpush3.bf16.msra.mxu1 %v446_v40 }
  0x4e   :  { %421 = vmatpush3.bf16.msra.mxu0 %v418_v27  ;;  %451 = vmatprep.subr.bf16.mxu1 %v450_v43 }
  0x4f   :  { %423 = vmatprep.subr.bf16.mxu0 %v422_v30 }
  0x51   :  { %453 = vmatpush3.bf16.msra.mxu1 %v450_v43 }
  0x52   :  { %425 = vmatpush3.bf16.msra.mxu0 %v422_v30  ;;  %455 = vmatprep.subr.bf16.mxu1 %v454_v46 }
  0x53   :  { %427 = vmatprep.subr.bf16.mxu0 %v426_v33 }
  0x55   :  { %457 = vmatpush3.bf16.msra.mxu1 %v454_v46 }
  0x56   :  { %429 = vmatpush3.bf16.msra.mxu0 %v426_v33  ;;  %459 = vmatprep.subr.bf16.mxu1 %v458_v49 }
  0x59   :  { %361 = vmatmul.mubr.f32.vlgmr.msra.gmra.mrb[0].mxu0 %v63_v34  ;;  %461 = vmatpush3.bf16.msra.mxu1 %v458_v49 }
 0x12c   :  { %v362_v51 = vpop.f32.mrb[0].mxu0 }
 0x12d   :  { %v159_v52 = vadd.f32 %v362_v51, %v290_v50  ;;  %v153_v53 = vpop.f32.mrb[1].mxu0 }
 0x12e   :  { %v154_v54 = vadd.f32 %v290_v50, %v153_v53 }
 0x12f   :  { %v165_v55 = vmul.f32 0.70710677, %v159_v52  ;;  %v163_v62 = vmul.f32 0.5, %v159_v52 }
 0x130   :  { %v164_v56 = vmul.f32 0.70710677, %v154_v54  ;;  %v162_v60 = vmul.f32 0.5, %v154_v54 }
 0x131   :  { %468 = verf.f32 %v165_v55 }
 0x132   :  { %470 = verf.f32 %v164_v56 }
 0x13b   :  { %v469_v57 = vpop.eup %468 }
 0x13c   :  { %v471_v58 = vpop.eup %470  ;;  %v169_v59 = vadd.f32 1.0, %v469_v57 }
 0x13d   :  { %v168_v61 = vadd.f32 1.0, %v471_v58 }
 0x13e   :  { %v171_v0 = vmul.f32 %v169_v59, %v163_v62 }
 0x13f   :  { %v170_v63 = vmul.f32 %v168_v61, %v162_v60 }
 0x141   :  { %395 = vmatprep.mubr.f32.mxu1 %v170_v63 }
 0x142   :  { %396 = vmatmul.mubr.f32.vlgmr.msra.gmra.mrb[0].mxu1 %v171_v0 }
 0x215   :  { %v397_v2 = vpop.f32.mrb[0].mxu1 }
 0x216   :  { %v267_v3 = vadd.f32 %v397_v2, %v291_v1  ;;  %v261_v4 = vpop.f32.mrb[1].mxu1 }
 0x217   :  { %v262_v5 = vadd.f32 %v291_v1, %v261_v4 }
 0x218   :  { %271 = vst [vmem:[#allocation8 + $0x8] sm:$0xff] %v267_v3 }
 0x219   :  { %270 = vst [vmem:[#allocation8] sm:$0xff] %v262_v5 }
 0x21a   :  { %549 = shalt.err (!%p546_p0)
}
 0x21b   :  { %s550_s4 = scalar_lea.hbm %s680_s5, 256 }
 0x21c   :  { %p551_p1 = scmp.ne.s32.totalorder %s680_s5, %s550_s4  ;;  %p554_p2 = scmp.lt.u32.totalorder %s550_s4, %s680_s5 }
 0x21e   :  { %p556_p3 = pnand %p554_p2, %p551_p1 }
 0x220   :  { %559 = shalt.err (!%p556_p3)
}
 0x221   :  { %283 = dma.vmem_to_hbm [thread:$0]  %s278_s9, 256, %s680_s5, [#allocation4], %s568_s30, %s568_s30, %s569_s6  }
 0x222   :  { %564 = dma.done.wait [#allocation4], 256  }
 0x223   :  { %565 = vsyncadd [#allocation4], 4294967040 }
 0x224   :  { %287 = vsyncpa [#allocation3], 1 }
 0x225   :  { %288 = vsyncpa [#allocation6], 1 }
 0x226   :  { %289 = vsyncpa [#allocation4], 1 }

</bundles_post_ra>
